<compile_context>
chip_gen: v5e
topology: v5e:2x2
jax: 0.10.0
libtpu: 0.0.40
codegen_flags: <defaults>
</compile_context>

<pallas_src>
import functools

import jax
import jax.numpy as jnp
from jax.experimental import pallas as pl
from jax.experimental.pallas import tpu as pltpu

LANE = 128
SUBLANE = 8
MAX_ROW_TILE = 4096                      # 4096 x 128 f32 block = 2 MiB
VMEM_LIMIT_BYTES = 48 * 1024 * 1024


def _num_tensorcores():
    """TensorCores a leading 'parallel' grid axis can shard across."""
    try:
        kind = jax.devices()[0].device_kind.lower()
    except Exception:
        return 1
    if any(s in kind for s in ("lite", "v5e", "v6")):
        return 1                                     # single-TC generations
    if any(s in kind for s in ("v7", "v4", "v5p")):
        return 2                                     # megacore / dual-TC
    if kind.strip().endswith("v5"):                  # v5p sometimes "TPU v5"
        return 2
    return 1


def _focal_loss_kernel(x_ref, t_ref, out_ref, *,
                       c0, c1, gamma, gamma_is_int,
                       row_tile, steps, valid_rows, full_tiles, need_mask):
    c = pl.program_id(0)      # core ("parallel") axis
    s = pl.program_id(1)      # reduction ("arbitrary") axis

    # out_ref's block index is constant along the reduction axis, so the block
    # stays VMEM-resident across it and doubles as the accumulator.
    @pl.when(s == 0)
    def _():
        out_ref[...] = jnp.zeros_like(out_ref)

    x = x_ref[...].astype(jnp.float32)
    t = t_ref[...].astype(jnp.float32)

    # F.binary_cross_entropy clamps log terms at -100 (PyTorch semantics).
    log_x = jnp.maximum(jnp.log(x), -100.0)
    log_1mx = jnp.maximum(jnp.log(1.0 - x), -100.0)
    # bce = -(t*log_x + (1-t)*log_1mx), refactored to save VALU ops.
    bce = -(t * (log_x - log_1mx) + log_1mx)

    pt = jnp.exp(-bce)
    q = 1.0 - pt
    if gamma_is_int:
        g = int(gamma)
        if g == 0:
            mod = jnp.ones_like(q)
        else:
            mod = q
            for _ in range(g - 1):
                mod = mod * q
    else:
        mod = jnp.power(q, gamma)

    # alpha_t = alpha*t + (1-alpha)*(1-t) == c0 + c1*t (scalars from wrapper).
    f_loss = (c0 + c1 * t) * mod * bce

    def fold(v):
        # (row_tile, 128) -> (8, 128): vreg-aligned sublane fold, VPU-only.
        return v.reshape(row_tile // SUBLANE, SUBLANE, v.shape[-1]).sum(axis=0)

    if need_mask:
        tile_idx = c * steps + s

        @pl.when(tile_idx < full_tiles)          # fully valid tile: no mask
        def _():
            out_ref[...] = out_ref[...] + fold(f_loss)

        @pl.when(tile_idx >= full_tiles)         # ragged / out-of-range tile
        def _():
            # Garbage rows of the partial boundary DMA flow through log/exp,
            # but the select discards any NaN/Inf they produce.
            row = tile_idx * row_tile + jax.lax.broadcasted_iota(
                jnp.int32, f_loss.shape, 0)
            out_ref[...] = out_ref[...] + fold(
                jnp.where(row < valid_rows, f_loss, 0.0))
    else:
        out_ref[...] = out_ref[...] + fold(f_loss)


def focal_loss(inputs, targets, alpha=0.25, gamma=2.0, reduction="mean"):
    """Pallas TPU binary focal loss ('mean' / 'sum' reductions)."""
    assert inputs.shape == targets.shape
    if reduction not in ("mean", "sum"):
        # TODO(synk): reduction='none' (per-element loss map) not lowered here.
        raise NotImplementedError("reduction must be 'mean' or 'sum'")

    n_elems = inputs.size

    # Flatten to a lane-dense [rows, 128] slab.  Rare ragged-size fallback:
    # pad with x=1, t=1 (contributes exactly zero focal loss).
    flat_x = inputs.reshape(-1)
    flat_t = targets.reshape(-1)
    pad = (-n_elems) % (SUBLANE * LANE)
    if pad:
        flat_x = jnp.concatenate([flat_x, jnp.ones((pad,), flat_x.dtype)])
        flat_t = jnp.concatenate([flat_t, jnp.ones((pad,), flat_t.dtype)])
    rows = (n_elems + pad) // LANE
    x2 = flat_x.reshape(rows, LANE)
    t2 = flat_t.reshape(rows, LANE)

    ncores = _num_tensorcores()
    if rows < ncores * SUBLANE:
        ncores = 1

    # Tight tiling: ncores*steps tiles of row_tile rows cover `rows` with at
    # most one ragged tile (no fully wasted grid step).
    steps = max(1, -(-rows // (ncores * MAX_ROW_TILE)))
    row_tile = SUBLANE * (-(-rows // (SUBLANE * ncores * steps)))
    total_tiles = ncores * steps
    num_tiles = -(-rows // row_tile)        # tiles overlapping valid rows
    full_tiles = rows // row_tile           # completely valid tiles
    need_mask = total_tiles != full_tiles   # some tile has invalid rows
    need_clamp = total_tiles > num_tiles    # some tile entirely out of range

    if need_clamp:
        def in_index(c, s):
            # Keep the DMA in-bounds; the kernel masks the contribution.
            return (jnp.minimum(c * steps + s, num_tiles - 1), 0)
    else:
        def in_index(c, s):
            return (c * steps + s, 0)

    alpha_f = float(alpha)
    gamma_f = float(gamma)
    gamma_is_int = gamma_f.is_integer() and 0.0 <= gamma_f <= 8.0

    kernel = functools.partial(
        _focal_loss_kernel,
        c0=1.0 - alpha_f,
        c1=2.0 * alpha_f - 1.0,
        gamma=gamma_f,
        gamma_is_int=gamma_is_int,
        row_tile=row_tile,
        steps=steps,
        valid_rows=rows,
        full_tiles=full_tiles,
        need_mask=need_mask,
    )

    partials = pl.pallas_call(
        kernel,
        out_shape=jax.ShapeDtypeStruct((ncores * SUBLANE, LANE), jnp.float32),
        grid_spec=pltpu.PrefetchScalarGridSpec(
            num_scalar_prefetch=0,
            grid=(ncores, steps),
            in_specs=[
                pl.BlockSpec((row_tile, LANE), in_index),
                pl.BlockSpec((row_tile, LANE), in_index),
            ],
            out_specs=pl.BlockSpec((SUBLANE, LANE), lambda c, s: (c, 0)),
        ),
        compiler_params=pltpu.CompilerParams(
            dimension_semantics=("parallel", "arbitrary"),
            vmem_limit_bytes=VMEM_LIMIT_BYTES,
        ),
    )(x2, t2)

    total = jnp.sum(partials)
    if reduction == "mean":
        return total / jnp.float32(n_elems)
    return total


def _focal_loss_ref(inputs, targets, alpha=0.25, gamma=2.0, reduction="mean"):
    x = inputs.astype(jnp.float32)
    t = targets.astype(jnp.float32)
    bce = -(t * jnp.maximum(jnp.log(x), -100.0)
            + (1.0 - t) * jnp.maximum(jnp.log(1.0 - x), -100.0))
    pt = jnp.exp(-bce)
    alpha_t = alpha * t + (1.0 - alpha) * (1.0 - t)
    f = alpha_t * (1.0 - pt) ** gamma * bce
    return jnp.mean(f) if reduction == "mean" else jnp.sum(f)


if __name__ == "__main__":
    key = jax.random.PRNGKey(0)
    k1, k2, k3, k4 = jax.random.split(key, 4)

    # Small NCHW shape: batch=2, channels=4, spatial=16x16.
    shape = (2, 4, 16, 16)
    inputs = jax.nn.sigmoid(jax.random.normal(k1, shape, dtype=jnp.float32))
    targets = jax.random.bernoulli(k2, p=0.3, shape=shape).astype(jnp.float32)

    loss = focal_loss(inputs, targets, alpha=0.25, gamma=2.0, reduction="mean")
    loss = jax.block_until_ready(loss)
    ref = _focal_loss_ref(inputs, targets)
    assert jnp.allclose(loss, ref, rtol=1e-4, atol=1e-6), (loss, ref)

    loss_sum = jax.block_until_ready(focal_loss(inputs, targets, reduction="sum"))
    ref_sum = _focal_loss_ref(inputs, targets, reduction="sum")
    assert jnp.allclose(loss_sum, ref_sum, rtol=1e-4, atol=1e-6), (loss_sum, ref_sum)

    # Moderate shape exercising multi-step reduction and ragged-tile masking:
    # rows = 9224 does not split evenly over cores*steps, so the last tile is
    # partial (garbage rows masked in-kernel).
    shape2 = (8, 1153, 128)
    inputs2 = jax.nn.sigmoid(jax.random.normal(k3, shape2, dtype=jnp.float32))
    targets2 = jax.random.bernoulli(k4, p=0.3, shape=shape2).astype(jnp.float32)
    loss2 = jax.block_until_ready(focal_loss(inputs2, targets2))
    ref2 = _focal_loss_ref(inputs2, targets2)
    assert jnp.allclose(loss2, ref2, rtol=1e-4, atol=1e-6), (loss2, ref2)

    print("KERNEL_OK")
</pallas_src>

<mosaic_0001>
module attributes {stable_mosaic.version = 11 : i64} {
  func.func @_focal_loss_kernel(%arg0: i32, %arg1: i32, %arg2: memref<16x128xf32, #tpu.memory_space<vmem>>, %arg3: memref<16x128xf32, #tpu.memory_space<vmem>>, %arg4: memref<8x128xf32, #tpu.memory_space<vmem>>) attributes {dimension_semantics = [#tpu.dimension_semantics<parallel>, #tpu.dimension_semantics<arbitrary>], iteration_bounds = array<i64: 1, 1>, scalar_prefetch = 0 : i64, scratch_operands = 0 : i64, tpu.core_type = #tpu.core_type<tc>, window_params = [{transform_indices = @transform_0, window_bounds = array<i64: 16, 128>}, {transform_indices = @transform_1, window_bounds = array<i64: 16, 128>}, {transform_indices = @transform_2, window_bounds = array<i64: 8, 128>}]} {
    %c0_i32 = arith.constant 0 : i32
    %0 = arith.cmpi eq, %arg1, %c0_i32 : i32
    %1 = arith.extui %0 : i1 to i32
    %c0_i32_0 = arith.constant 0 : i32
    %2 = arith.cmpi ne, %1, %c0_i32_0 : i32
    scf.if %2 {
      %cst_16 = arith.constant 0.000000e+00 : f32
      %35 = vector.broadcast %cst_16 : f32 to vector<8x128xf32>
      %c0_17 = arith.constant 0 : index
      %c0_18 = arith.constant 0 : index
      %36 = vector.load %arg4[%c0_17, %c0_18] : memref<8x128xf32, #tpu.memory_space<vmem>>, vector<8x128xf32>
      tpu.vector_store %arg4[%c0_17, %c0_18], %35 {strides = array<i32>} : memref<8x128xf32, #tpu.memory_space<vmem>>, vector<8x128xf32>,
    } else {
    }
    %c0 = arith.constant 0 : index
    %c0_1 = arith.constant 0 : index
    %3 = vector.load %arg2[%c0, %c0_1] : memref<16x128xf32, #tpu.memory_space<vmem>>, vector<16x128xf32>
    %c0_2 = arith.constant 0 : index
    %c0_3 = arith.constant 0 : index
    %4 = vector.load %arg3[%c0_2, %c0_3] : memref<16x128xf32, #tpu.memory_space<vmem>>, vector<16x128xf32>
    %5 = math.log %3 : vector<16x128xf32>
    %cst = arith.constant -1.000000e+02 : f32
    %6 = vector.broadcast %cst : f32 to vector<16x128xf32>
    %7 = arith.maximumf %5, %6 : vector<16x128xf32>
    %cst_4 = arith.constant 1.000000e+00 : f32
    %8 = vector.broadcast %cst_4 : f32 to vector<16x128xf32>
    %9 = arith.subf %8, %3 : vector<16x128xf32>
    %10 = math.log %9 : vector<16x128xf32>
    %cst_5 = arith.constant -1.000000e+02 : f32
    %11 = vector.broadcast %cst_5 : f32 to vector<16x128xf32>
    %12 = arith.maximumf %10, %11 : vector<16x128xf32>
    %13 = arith.subf %7, %12 : vector<16x128xf32>
    %14 = arith.mulf %4, %13 : vector<16x128xf32>
    %15 = arith.addf %14, %12 : vector<16x128xf32>
    %cst_6 = arith.constant 0.000000e+00 : f32
    %16 = vector.broadcast %cst_6 : f32 to vector<16x128xf32>
    %17 = arith.subf %16, %15 : vector<16x128xf32>
    %cst_7 = arith.constant 0.000000e+00 : f32
    %18 = vector.broadcast %cst_7 : f32 to vector<16x128xf32>
    %19 = arith.subf %18, %17 : vector<16x128xf32>
    %20 = math.exp %19 : vector<16x128xf32>
    %cst_8 = arith.constant 1.000000e+00 : f32
    %21 = vector.broadcast %cst_8 : f32 to vector<16x128xf32>
    %22 = arith.subf %21, %20 : vector<16x128xf32>
    %23 = arith.mulf %22, %22 : vector<16x128xf32>
    %cst_9 = arith.constant -5.000000e-01 : f32
    %24 = vector.broadcast %cst_9 : f32 to vector<16x128xf32>
    %25 = arith.mulf %24, %4 : vector<16x128xf32>
    %cst_10 = arith.constant 7.500000e-01 : f32
    %26 = vector.broadcast %cst_10 : f32 to vector<16x128xf32>
    %27 = arith.addf %26, %25 : vector<16x128xf32>
    %28 = arith.mulf %27, %23 : vector<16x128xf32>
    %29 = arith.mulf %28, %17 : vector<16x128xf32>
    %c0_11 = arith.constant 0 : index
    %c0_12 = arith.constant 0 : index
    %30 = vector.load %arg4[%c0_11, %c0_12] : memref<8x128xf32, #tpu.memory_space<vmem>>, vector<8x128xf32>
    %31 = vector.shape_cast %29 : vector<16x128xf32> to vector<2x8x128xf32>
    %cst_13 = arith.constant dense<0.000000e+00> : vector<8x128xf32>
    %32 = vector.multi_reduction <add>, %31, %cst_13 [0] : vector<2x8x128xf32> to vector<8x128xf32>
    %33 = arith.addf %30, %32 : vector<8x128xf32>
    %c0_14 = arith.constant 0 : index
    %c0_15 = arith.constant 0 : index
    %34 = vector.load %arg4[%c0_14, %c0_15] : memref<8x128xf32, #tpu.memory_space<vmem>>, vector<8x128xf32>
    tpu.vector_store %arg4[%c0_14, %c0_15], %33 {strides = array<i32>} : memref<8x128xf32, #tpu.memory_space<vmem>>, vector<8x128xf32>,
    return
  }
  func.func @transform_0(%arg0: i32, %arg1: i32) -> (i32, i32) {
    %c1_i32 = arith.constant 1 : i32
    %0 = arith.muli %arg0, %c1_i32 : i32
    %1 = arith.addi %0, %arg1 : i32
    %c0_i32 = arith.constant 0 : i32
    %c0_i32_0 = arith.constant 0 : i32
    return %1, %c0_i32 : i32, i32
  }
  func.func @transform_1(%arg0: i32, %arg1: i32) -> (i32, i32) {
    %c1_i32 = arith.constant 1 : i32
    %0 = arith.muli %arg0, %c1_i32 : i32
    %1 = arith.addi %0, %arg1 : i32
    %c0_i32 = arith.constant 0 : i32
    %c0_i32_0 = arith.constant 0 : i32
    return %1, %c0_i32 : i32, i32
  }
  func.func @transform_2(%arg0: i32, %arg1: i32) -> (i32, i32) {
    %c0_i32 = arith.constant 0 : i32
    %c0_i32_0 = arith.constant 0 : i32
    return %arg0, %c0_i32 : i32, i32
  }
}

</mosaic_0001>

<bundles_post_ra>
// kernel: tpu_custom_call.1
= control target key start
LH: loop header
LB: loop body
LE: loop exit
PB: predicated region body
PF: predicated region fallthrough
CT: control target
= control target key end

     0   :  { %7 = vsyncpa [#allocation3], 0  ;;  %s252_s0 = inlined_call_operand.hbm [shape: f32[16,128], index: 0, kind: input, shape index: {}]   ;;  %s253_s1 = inlined_call_operand.hbm [shape: f32[16,128], index: 1, kind: input, shape index: {}]   ;;  %s254_s2 = inlined_call_operand.hbm [shape: f32[8,128], index: 2, kind: output, shape index: {}]  }
   0x1   :  { %8 = vsyncpa [#allocation6], 0 }
   0x2   :  { %9 = vsyncpa [#allocation4], 0  ;;  %s18_s11 = sshll.u32 %s252_s0, 4  ;;  %s223_s12 = smov [#allocation2]   ;;  %s19_s11 = int_to_ptr.hbm [resolvable:$true] %s18_s11 }
   0x3   :  { %s20_s13 = sshll.u32 %s223_s12, 4  ;;  %s35_s16 = sshll.u32 %s253_s1, 4  ;;  %s21_s13 = int_to_ptr.vmem [resolvable:$true] %s20_s13  ;;  %s36_s16 = int_to_ptr.hbm [resolvable:$true] %s35_s16 }
   0x4   :  { %s224_s17 = smov 128   ;;  %s225_s18 = smov 8  }
   0x5   :  { %26 = dma.hbm_to_vmem [thread:$0]  %s19_s11, 256, %s21_s13, [#allocation3], %s224_s17, %s224_s17, %s225_s18  }
   0x6   :  { %s226_s19 = smov [#allocation5]  }
   0x7   :  { %s37_s20 = sshll.u32 %s226_s19, 4  ;;  %s38_s20 = int_to_ptr.vmem [resolvable:$true] %s37_s20 }
   0x8   :  { %43 = dma.hbm_to_vmem [thread:$0]  %s36_s16, 256, %s38_s20, [#allocation6], %s224_s17, %s224_s17, %s225_s18  }
   0x9   :  { %217 = dma.done.wait [#allocation3], 256  }
   0xa   :  { %218 = vsyncadd [#allocation3], 4294967040 }
   0xb   :  { %219 = dma.done.wait [#allocation6], 256  }
   0xc   :  { %220 = vsyncadd [#allocation6], 4294967040  ;;  %v61_v0 = vld [vmem:[#allocation2] sm:$0xff]  ;;  %v62_v1 = vld [vmem:[#allocation2 + $0x8] sm:$0xff]  ;;  %s227_s0 = smov [#allocation7]   ;;  %s116_s23 = sshll.u32 %s254_s2, 4  ;;  %s117_s23 = int_to_ptr.hbm [resolvable:$true] %s116_s23 }
   0xd   :  { %133 = vlog2.f32 %v61_v0  ;;  %v71_v2 = vsub.f32 1.0, %v61_v0  ;;  %v72_v3 = vsub.f32 1.0, %v62_v1  ;;  %v63_v15 = vld [vmem:[#allocation5] sm:$0xff]  ;;  %v64_v17 = vld [vmem:[#allocation5 + $0x8] sm:$0xff]  ;;  %s114_s1 = sshll.u32 %s227_s0, 4  ;;  %s115_s1 = int_to_ptr.vmem [resolvable:$true] %s114_s1 }
   0xe   :  { %135 = vlog2.f32 %v62_v1  ;;  %v97_v30 = vmul.f32 -0.5, %v63_v15  ;;  %v98_v31 = vmul.f32 -0.5, %v64_v17 }
   0xf   :  { %137 = vlog2.f32 %v71_v2 }
  0x10   :  { %139 = vlog2.f32 %v72_v3  ;;  %v99_v35 = vadd.f32 0.75, %v97_v30  ;;  %v100_v37 = vadd.f32 0.75, %v98_v31 }
  0x13   :  { %v134_v4 = vpop.eup %133 }
  0x14   :  { %v136_v5 = vpop.eup %135  ;;  %v66_v6 = vmul.f32 0.6931472, %v134_v4 }
  0x15   :  { %v138_v7 = vpop.eup %137  ;;  %v68_v8 = vmul.f32 0.6931472, %v136_v5 }
  0x16   :  { %v140_v9 = vpop.eup %139  ;;  %v69_v10 = vmax.f32 %v66_v6, -100.0  ;;  %v74_v11 = vmul.f32 0.6931472, %v138_v7 }
  0x17   :  { %v70_v12 = vmax.f32 %v68_v8, -100.0  ;;  %v76_v13 = vmul.f32 0.6931472, %v140_v9 }
  0x18   :  { %v77_v14 = vmax.f32 %v74_v11, -100.0 }
  0x19   :  { %v78_v16 = vmax.f32 %v76_v13, -100.0 }
  0x1a   :  { %v79_v18 = vsub.f32 %v69_v10, %v77_v14 }
  0x1b   :  { %v80_v19 = vsub.f32 %v70_v12, %v78_v16 }
  0x1c   :  { %v81_v20 = vmul.f32 %v79_v18, %v63_v15 }
  0x1d   :  { %v82_v21 = vmul.f32 %v80_v19, %v64_v17 }
  0x1e   :  { %v83_v22 = vadd.f32 %v81_v20, %v77_v14 }
  0x1f   :  { %v84_v23 = vadd.f32 %v82_v21, %v78_v16 }
  0x20   :  { %v85_v24 = vsub.f32 0.0, %v83_v22 }
  0x21   :  { %v86_v25 = vsub.f32 0.0, %v84_v23 }
  0x22   :  { %v87_v26 = vsub.f32 0.0, %v85_v24 }
  0x23   :  { %v88_v27 = vsub.f32 0.0, %v86_v25 }
  0x24   :  { %v89_v28 = vmul.f32 1.442695, %v87_v26 }
  0x25   :  { %v91_v29 = vmul.f32 1.442695, %v88_v27 }
  0x26   :  { %141 = vpow2.f32 %v89_v28 }
  0x27   :  { %143 = vpow2.f32 %v91_v29 }
  0x2c   :  { %v142_v32 = vpop.eup %141 }
  0x2d   :  { %v144_v33 = vpop.eup %143  ;;  %v93_v34 = vsub.f32 1.0, %v142_v32 }
  0x2e   :  { %v94_v36 = vsub.f32 1.0, %v144_v33 }
  0x2f   :  { %v95_v38 = vmul.f32 %v93_v34, %v93_v34 }
  0x30   :  { %v96_v39 = vmul.f32 %v94_v36, %v94_v36 }
  0x31   :  { %v101_v40 = vmul.f32 %v99_v35, %v95_v38 }
  0x32   :  { %v102_v41 = vmul.f32 %v100_v37, %v96_v39 }
  0x33   :  { %v103_v42 = vmul.f32 %v101_v40, %v85_v24 }
  0x34   :  { %v104_v43 = vmul.f32 %v102_v41, %v86_v25 }
  0x36   :  { %v106_v44 = vadd.f32 %v104_v43, %v103_v42 }
  0x38   :  { %108 = vst [vmem:[#allocation7] sm:$0xff] %v106_v44 }
  0x39   :  { %119 = dma.vmem_to_hbm [thread:$0]  %s115_s1, 128, %s117_s23, [#allocation4]  }
  0x3a   :  { %221 = dma.done.wait [#allocation4], 128  }
  0x3b   :  { %222 = vsyncadd [#allocation4], 4294967168 }
  0x3c   :  { %124 = vsyncpa [#allocation3], 1 }
  0x3d   :  { %125 = vsyncpa [#allocation6], 1 }
  0x3e   :  { %126 = vsyncpa [#allocation4], 1 }

</bundles_post_ra>
